<compile_context>
chip_gen: v7x
topology: tpu7x:2x2x1
jax: 0.10.0
libtpu: 0.0.40
codegen_flags: <defaults>
</compile_context>

<pallas_src>
import jax
import jax.numpy as jnp
from jax.experimental import pallas as pl
from jax.experimental.pallas import tpu as pltpu


def _adaptive_weight_kernel(w_ref, x1_ref, x2_ref, out_ref):
    # w_ref lives in SMEM: shape (2,) f32 (the learnable weights).
    w1 = w_ref[0] * w_ref[0]
    w2 = w_ref[1] * w_ref[1]
    # Elementwise hot path on the VMEM tiles (VPU).
    out_ref[...] = w1 * x1_ref[...] + w2 * x2_ref[...]


def adaptive_weight(obj1, obj2, weight):
    """Pallas implementation of AdaptiveWeight.forward.

    obj1, obj2: arrays of identical (arbitrary) shape.
    weight:     array of shape (2,).
    Returns (weighted_obj, w1, w2) with weighted_obj same shape as obj1 and
    w1, w2 scalars.
    """
    assert obj1.shape == obj2.shape, "obj1/obj2 shape mismatch"
    assert obj1.dtype == obj2.dtype, "obj1/obj2 dtype mismatch"
    orig_shape = obj1.shape
    orig_dtype = obj1.dtype
    total = obj1.size

    # Single f32 streaming path (see TODO above for a bf16 variant).
    obj1 = obj1.astype(jnp.float32)
    obj2 = obj2.astype(jnp.float32)
    weight = weight.astype(jnp.float32)

    # Scalar outputs of the module (two multiplies; fused by XLA, not worth
    # a per-grid-step SMEM write inside the kernel).
    w1 = weight[0] * weight[0]
    w2 = weight[1] * weight[1]

    lane = 128
    sublane = 8

    # Lane-dense slab: (rows, 128).  Pad ONLY to the 8x128 vreg boundary
    # (<= 1023 extra elements), never to a whole tile, so the zero-copy
    # fast path is the common case.
    rows = pl.cdiv(total, lane)
    rows = pl.cdiv(rows, sublane) * sublane
    padded_total = rows * lane

    # Tile sizing: up to 4 MiB per input block (8192 rows), but always at
    # least 2 grid steps when the slab allows it so v7x's two TensorCores
    # both get work on medium-size tensors.
    max_tile_rows = 8192
    if rows <= sublane:
        tile_rows = rows
    else:
        half_rows = pl.cdiv(pl.cdiv(rows, 2), sublane) * sublane
        tile_rows = min(max_tile_rows, half_rows)
    grid_steps = pl.cdiv(rows, tile_rows)  # ragged final block is masked

    def to_slab(x):
        flat = x.reshape(-1)
        if padded_total != total:
            flat = jnp.pad(flat, (0, padded_total - total))
        return flat.reshape(rows, lane)

    x1 = to_slab(obj1)
    x2 = to_slab(obj2)

    cost = pl.CostEstimate(
        flops=2 * total,
        transcendentals=0,
        bytes_accessed=3 * total * 4,  # read obj1, obj2; write out (f32)
    )

    out = pl.pallas_call(
        _adaptive_weight_kernel,
        out_shape=jax.ShapeDtypeStruct((rows, lane), jnp.float32),
        grid_spec=pltpu.PrefetchScalarGridSpec(
            num_scalar_prefetch=0,
            grid=(grid_steps,),
            in_specs=[
                pl.BlockSpec(memory_space=pltpu.SMEM),              # weight (2,)
                pl.BlockSpec((tile_rows, lane), lambda i: (i, 0)),  # obj1 tile
                pl.BlockSpec((tile_rows, lane), lambda i: (i, 0)),  # obj2 tile
            ],
            out_specs=pl.BlockSpec((tile_rows, lane), lambda i: (i, 0)),
        ),
        compiler_params=pltpu.CompilerParams(
            # Megacore-friendly on v7x; near-neutral on v5e/v6e.
            # TODO(synk): if a trace shows v7x is not splitting this axis
            # across TensorCores, switch to pltpu.CORE_PARALLEL.
            dimension_semantics=("parallel",),
            vmem_limit_bytes=40 * 1024 * 1024,  # headroom for 4 MiB blocks
        ),
        cost_estimate=cost,
    )(weight, x1, x2)

    weighted = out.reshape(-1)[:total].reshape(orig_shape)
    if orig_dtype != jnp.float32:
        weighted = weighted.astype(orig_dtype)
    return weighted, w1, w2


if __name__ == "__main__":
    key = jax.random.PRNGKey(0)
    k1, k2, k3, k4, k5, k6 = jax.random.split(key, 6)

    # Deterministic parameter init: nn.Parameter(torch.ones(weight_num)).
    weight = jnp.ones((2,), dtype=jnp.float32)

    # Case 1: small NCHW shape consistent with the module (aligned, no pad).
    obj1 = jax.random.normal(k1, (2, 4, 16, 16), dtype=jnp.float32)
    obj2 = jax.random.normal(k2, (2, 4, 16, 16), dtype=jnp.float32)
    weighted, w1, w2 = adaptive_weight(obj1, obj2, weight)
    jax.block_until_ready((weighted, w1, w2))

    ref_w1 = weight[0] * weight[0]
    ref_w2 = weight[1] * weight[1]
    ref = ref_w1 * obj1 + ref_w2 * obj2
    assert weighted.shape == obj1.shape
    assert jnp.allclose(weighted, ref, atol=1e-6)
    assert jnp.allclose(w1, ref_w1) and jnp.allclose(w2, ref_w2)

    # Case 2: awkward (non-128-divisible) shape -> exercises the minimal
    # (<=1023 element) padding path.
    obj1b = jax.random.normal(k3, (3, 5, 7, 11), dtype=jnp.float32)
    obj2b = jax.random.normal(k4, (3, 5, 7, 11), dtype=jnp.float32)
    weighted_b, w1b, w2b = adaptive_weight(obj1b, obj2b, weight)
    jax.block_until_ready((weighted_b, w1b, w2b))

    ref_b = ref_w1 * obj1b + ref_w2 * obj2b
    assert weighted_b.shape == obj1b.shape
    assert jnp.allclose(weighted_b, ref_b, atol=1e-6)
    assert jnp.allclose(w1b, ref_w1) and jnp.allclose(w2b, ref_w2)

    # Case 3: shape chosen so rows (24) is NOT a multiple of tile_rows (16)
    # -> exercises the ragged (masked) final block, with a non-unit weight
    # so the squaring math is actually tested.
    weight_c = jnp.array([1.5, -0.5], dtype=jnp.float32)
    obj1c = jax.random.normal(k5, (3, 4, 16, 16), dtype=jnp.float32)
    obj2c = jax.random.normal(k6, (3, 4, 16, 16), dtype=jnp.float32)
    weighted_c, w1c, w2c = adaptive_weight(obj1c, obj2c, weight_c)
    jax.block_until_ready((weighted_c, w1c, w2c))

    ref_w1c = weight_c[0] * weight_c[0]
    ref_w2c = weight_c[1] * weight_c[1]
    ref_c = ref_w1c * obj1c + ref_w2c * obj2c
    assert weighted_c.shape == obj1c.shape
    assert jnp.allclose(weighted_c, ref_c, atol=1e-6)
    assert jnp.allclose(w1c, ref_w1c) and jnp.allclose(w2c, ref_w2c)

    print("KERNEL_OK")
</pallas_src>

<mosaic_0001>
module attributes {stable_mosaic.version = 11 : i64} {
  func.func @_adaptive_weight_kernel(%arg0: i32, %arg1: memref<2xf32, #tpu.memory_space<smem>>, %arg2: memref<8x128xf32, #tpu.memory_space<vmem>>, %arg3: memref<8x128xf32, #tpu.memory_space<vmem>>, %arg4: memref<8x128xf32, #tpu.memory_space<vmem>>) attributes {dimension_semantics = [#tpu.dimension_semantics<parallel>], iteration_bounds = array<i64: 2>, scalar_prefetch = 0 : i64, scratch_operands = 0 : i64, tpu.core_type = #tpu.core_type<tc>, window_params = [{transform_indices = @transform_0, window_bounds = array<i64: 2>}, {transform_indices = @transform_1, window_bounds = array<i64: 8, 128>}, {transform_indices = @transform_2, window_bounds = array<i64: 8, 128>}, {transform_indices = @transform_3, window_bounds = array<i64: 8, 128>}]} {
    %c0 = arith.constant 0 : index
    %0 = memref.load %arg1[%c0] : memref<2xf32, #tpu.memory_space<smem>>
    %c0_0 = arith.constant 0 : index
    %1 = memref.load %arg1[%c0_0] : memref<2xf32, #tpu.memory_space<smem>>
    %2 = arith.mulf %0, %1 : f32
    %c1 = arith.constant 1 : index
    %3 = memref.load %arg1[%c1] : memref<2xf32, #tpu.memory_space<smem>>
    %c1_1 = arith.constant 1 : index
    %4 = memref.load %arg1[%c1_1] : memref<2xf32, #tpu.memory_space<smem>>
    %5 = arith.mulf %3, %4 : f32
    %c0_2 = arith.constant 0 : index
    %c0_3 = arith.constant 0 : index
    %6 = vector.load %arg2[%c0_2, %c0_3] : memref<8x128xf32, #tpu.memory_space<vmem>>, vector<8x128xf32>
    %7 = vector.broadcast %2 : f32 to vector<8x128xf32>
    %8 = arith.mulf %7, %6 : vector<8x128xf32>
    %c0_4 = arith.constant 0 : index
    %c0_5 = arith.constant 0 : index
    %9 = vector.load %arg3[%c0_4, %c0_5] : memref<8x128xf32, #tpu.memory_space<vmem>>, vector<8x128xf32>
    %10 = vector.broadcast %5 : f32 to vector<8x128xf32>
    %11 = arith.mulf %10, %9 : vector<8x128xf32>
    %12 = arith.addf %8, %11 : vector<8x128xf32>
    %c0_6 = arith.constant 0 : index
    %c0_7 = arith.constant 0 : index
    %13 = vector.load %arg4[%c0_6, %c0_7] : memref<8x128xf32, #tpu.memory_space<vmem>>, vector<8x128xf32>
    tpu.vector_store %arg4[%c0_6, %c0_7], %12 {strides = array<i32>} : memref<8x128xf32, #tpu.memory_space<vmem>>, vector<8x128xf32>,
    return
  }
  func.func @transform_0(%arg0: i32) -> i32 {
    %c0_i32 = arith.constant 0 : i32
    %c0_i32_0 = arith.constant 0 : i32
    return %c0_i32 : i32
  }
  func.func @transform_1(%arg0: i32) -> (i32, i32) {
    %c0_i32 = arith.constant 0 : i32
    %c0_i32_0 = arith.constant 0 : i32
    return %arg0, %c0_i32 : i32, i32
  }
  func.func @transform_2(%arg0: i32) -> (i32, i32) {
    %c0_i32 = arith.constant 0 : i32
    %c0_i32_0 = arith.constant 0 : i32
    return %arg0, %c0_i32 : i32, i32
  }
  func.func @transform_3(%arg0: i32) -> (i32, i32) {
    %c0_i32 = arith.constant 0 : i32
    %c0_i32_0 = arith.constant 0 : i32
    return %arg0, %c0_i32 : i32, i32
  }
}

</mosaic_0001>

<bundles_post_ra>
// kernel: tpu_custom_call.1
= control target key start
LH: loop header
LB: loop body
LE: loop exit
PB: predicated region body
PF: predicated region fallthrough
CT: control target
= control target key end

     0   :  { %8 = vsyncpa [#allocation5], 0  ;;  %s854_s0 = inlined_call_operand.hbm [shape: f32[2], index: 0, kind: input, shape index: {}]   ;;  %s855_s1 = inlined_call_operand.hbm [shape: f32[16,128], index: 1, kind: input, shape index: {}]   ;;  %s856_s2 = inlined_call_operand.hbm [shape: f32[16,128], index: 2, kind: input, shape index: {}]   ;;  %s857_s3 = inlined_call_operand.hbm [shape: f32[16,128], index: 3, kind: output, shape index: {}]  }
   0x1   :  { %9 = vsyncpa [#allocation3], 0 }
   0x2   :  { %11 = vsyncpa [#allocation3 + $0x1], 0 }
   0x3   :  { %12 = vsyncpa [#allocation8], 0 }
   0x4   :  { %14 = vsyncpa [#allocation8 + $0x1], 0 }
   0x5   :  { %15 = vsyncpa [#allocation4], 0 }
   0x6   :  { %17 = vsyncpa [#allocation4 + $0x1], 0  ;;  %s619_s12 = smov 0   ;;  %s621_s13 = smov 0  }
   0x7   :  { %s623_s14 = smov 0   ;;  %s625_s15 = smov 0  }
   0x8 LB: > { %s640_s16 = sadd.s32 4294967295, %s593_s15   ;;  %s366_s17 = sadd.s32 4294967294, %s593_s15   ;;  %s593_s15 = sphi %s625_s15, %s879_s15   ;;  %s589_s14 = sphi %s623_s14, %s878_s14   ;;  %s585_s13 = sphi %s621_s13, %s877_s13   ;;  %s581_s12 = sphi %s619_s12, %s876_s12  }
   0x9   : > { %s644_s18 = sadd.s32 1, %s593_s15   ;;  %s51_s19 = sadd.s32 1, %s589_s14 }
   0xa   : > { %s48_s20 = ssub.s32 %s593_s15, %s644_s18  ;;  %p58_p0 = scmp.ne.s32.totalorder %s589_s14, %s585_s13 }
   0xb   : > { %p49_p1 = scmp.eq.s32.totalorder %s48_s20, 0  ;;  %p64_p2 = scmp.ne.s32.totalorder %s585_s13, %s581_s12 }
   0xc   : > { %p858_p3 = scmp.eq.s32.totalorder %s640_s16, 0  ;;  %p114_p4 = scmp.eq.s32.totalorder %s640_s16, 1 }
   0xd   : > { %s656_s21 = scalar_select %p49_p1, %s589_s14, %s51_s19  }
   0xe   : > { %p660_p5 = por %p858_p3, %p64_p2  ;;  %p667_p6 = por %p114_p4, %p58_p0 }
   0xf   : > { %p120_p7 = scmp.eq.s32.totalorder %s366_s17, 1  ;;  %p367_p8 = scmp.ge.s32.totalorder %s593_s15, 1 }
  0x10   : > { %s862_s22 = scalar_select %p660_p5, 1, 0 }
  0x11   : > { %s863_s23 = scalar_select %p667_p6, 1, 0 }
  0x12   : > { %p127_p9 = scmp.lt.s32.totalorder %s593_s15, 3  ;;  %p673_p10 = por %p120_p7, %p64_p2 }
  0x13   : > { %p59_p13 = scmp.eq.s32.totalorder %s593_s15, 0  ;;  %p410_p1 = scmp.lt.s32.totalorder %s593_s15, 2 }
  0x14   : > { %s864_s24 = scalar_select %p673_p10, 1, 0 }
  0x15   : > { %p677_p11 = pnand %p367_p8, %p127_p9  ;;  %s687_s26 = sand.u32 1, %s589_s14  }
  0x16   : > { %p692_p3 = por %p59_p13, %p58_p0  ;;  %p867_p2 = scmp.eq.s32.totalorder %s640_s16, 0 }
  0x17   : > { %s865_s25 = scalar_select %p677_p11, 1, 0 }
  0x18   : > { %p394_p4 = pneg %p677_p11  ;;  %s370_s28 = sshll.u32 %s687_s26, 3 }
  0x19   : > { %s371_s29 = sshll.u32 %s593_s15, 7  ;;  %s446_s8 = scalar_lea.hbm %s854_s0, 16 }
  0x1a   : > { %p395_p7 = pnand %p394_p4, %p867_p2  ;;  %s705_s5 = scalar_lea.hbm %s855_s1, %s371_s29 }
  0x1b   : > { %p447_p0 = scmp.ne.s32.totalorder %s854_s0, %s446_s8  ;;  %p453_p4 = scmp.lt.u32.totalorder %s446_s8, %s854_s0 }
  0x1c   : > { %p448_p8 = pneg %p395_p7 }
  0x1e   : > { %p449_p9 = pnand %p448_p8, %p447_p0 }
  0x20   : > { %p450_p13 = pneg %p449_p9 }
  0x22   : > { %p455_p2 = pnand %p453_p4, %p450_p13 }
  0x24   : > { %458 = shalt.err (!%p455_p2)
}
  0x25   : > { %s595_s19 = smov [#allocation2]   ;;  %s153_s4 = scalar_lea.vmem [#allocation6], %s370_s28 }
  0x26   : > { %397 = dma.hbm_to_smem (!%p395_p7), %s854_s0, 16, %s595_s19, [#allocation5]  }
  0x27   : > { %s160_s6 = sshll.u32 %s153_s4, 4  ;;  %p725_p0 = pnand %p410_p1, %p692_p3  ;;  %s729_s6 = int_to_ptr.vmem [resolvable:$true] %s160_s6 }
  0x28   : > { %s150_s8 = scalar_lea.sflag [#allocation3], %s687_s26  ;;  %s459_s9 = scalar_lea.hbm %s705_s5, 128 }
  0x29   : > { %p460_p8 = scmp.ne.s32.totalorder %s705_s5, %s459_s9  ;;  %p461_p9 = pneg %p725_p0 }
  0x2a   : > { %s464_s11 = scalar_lea.hbm %s855_s1, 256  ;;  %p465_p3 = scmp.lt.u32.totalorder %s705_s5, %s855_s1 }
  0x2b   : > { %p462_p7 = pnand %p461_p9, %p460_p8  ;;  %p466_p1 = scmp.lt.u32.totalorder %s464_s11, %s459_s9 }
  0x2c   : > { %p468_p2 = scmp.lt.u32.totalorder %s459_s9, %s705_s5 }
  0x2d   : > { %p463_p13 = pneg %p462_p7  ;;  %p467_p4 = por %p466_p1, %p465_p3 }
  0x2f   : > { %p469_p12 = por %p468_p2, %p467_p4 }
  0x31   : > { %p470_p10 = pnand %p469_p12, %p463_p13 }
  0x33   : > { %473 = shalt.err (!%p470_p10)
}
  0x34   : > { %s474_s20 = scalar_lea.vmem %s729_s6, 128  ;;  %s596_s30 = smov [#allocation6]  }
  0x35   : > { %p475_p8 = scmp.ne.s32.totalorder %s729_s6, %s474_s20  ;;  %s479_s4 = sshll.u32 %s596_s30, 4  ;;  %s480_s4 = int_to_ptr.vmem [resolvable:$false] %s479_s4 }
  0x36   : > { %s481_s10 = scalar_lea.vmem %s480_s4, 256  ;;  %p482_p5 = scmp.lt.s32.totalorder %s729_s6, %s480_s4 }
  0x37   : > { %p477_p7 = pnand %p475_p8, %p461_p9  ;;  %p483_p3 = scmp.lt.s32.totalorder %s481_s10, %s474_s20 }
  0x39   : > { %p478_p6 = pneg %p477_p7  ;;  %p484_p1 = por %p483_p3, %p482_p5 }
  0x3b   : > { %p485_p4 = pnand %p484_p1, %p478_p6 }
  0x3d   : > { %488 = shalt.err (!%p485_p4)
}
  0x3e   : > { %401 = dma.hbm_to_vmem [thread:$0]  (!%p725_p0), %s705_s5, 128, %s729_s6, %s150_s8  }
  0x3f   : > { %s762_s11 = scalar_lea.hbm %s856_s2, %s371_s29  ;;  %s171_s17 = scalar_lea.vmem [#allocation7], %s370_s28 }
  0x40   : > { %s178_s19 = sshll.u32 %s171_s17, 4  ;;  %s168_s20 = scalar_lea.sflag [#allocation8], %s687_s26  ;;  %s179_s19 = int_to_ptr.vmem [resolvable:$true] %s178_s19 }
  0x41   : > { %s489_s30 = scalar_lea.hbm %s762_s11, 128  ;;  %s494_s29 = scalar_lea.hbm %s856_s2, 256 }
  0x42   : > { %p490_p5 = scmp.ne.s32.totalorder %s762_s11, %s489_s30  ;;  %p495_p12 = scmp.lt.u32.totalorder %s762_s11, %s856_s2 }
  0x43   : > { %p496_p13 = scmp.lt.u32.totalorder %s494_s29, %s489_s30  ;;  %p498_p8 = scmp.lt.u32.totalorder %s489_s30, %s762_s11 }
  0x44   : > { %p492_p6 = pnand %p490_p5, %p461_p9 }
  0x45   : > { %p497_p2 = por %p496_p13, %p495_p12 }
  0x46   : > { %p493_p10 = pneg %p492_p6 }
  0x47   : > { %p499_p7 = por %p498_p8, %p497_p2 }
  0x49   : > { %p500_p3 = pnand %p499_p7, %p493_p10 }
  0x4b   : > { %503 = shalt.err (!%p500_p3)
}
  0x4c   : > { %s504_s26 = scalar_lea.vmem %s179_s19, 128  ;;  %s597_s28 = smov [#allocation7]  }
  0x4d   : > { %p505_p1 = scmp.ne.s32.totalorder %s179_s19, %s504_s26  ;;  %s509_s10 = sshll.u32 %s597_s28, 4  ;;  %s510_s10 = int_to_ptr.vmem [resolvable:$false] %s509_s10 }
  0x4e   : > { %s511_s9 = scalar_lea.vmem %s510_s10, 256  ;;  %p512_p6 = scmp.lt.s32.totalorder %s179_s19, %s510_s10 }
  0x4f   : > { %p507_p4 = pnand %p505_p1, %p461_p9  ;;  %p513_p11 = scmp.lt.s32.totalorder %s511_s9, %s504_s26 }
  0x51   : > { %p508_p5 = pneg %p507_p4  ;;  %p514_p12 = por %p513_p11, %p512_p6 }
  0x53   : > { %p515_p13 = pnand %p514_p12, %p508_p5 }
  0x55   : > { %518 = shalt.err (!%p515_p13)
}
  0x56   : > { %404 = dma.hbm_to_vmem [thread:$0]  (!%p725_p0), %s762_s11, 128, %s179_s19, %s168_s20  }
  0x57   : > { %p869_p10 = scmp.ne.s32.totalorder %s865_s25, 0 }
  0x58   : > { %p870_p2 = scmp.eq.s32.totalorder (!%p869_p10), %s640_s16, 0 }
  0x59   : > { %187 = sbr.rel (%p869_p10) target bundleno = 133 (0x85), region = 32 }
  0x60   : > { %564 = dma.done.wait (%p870_p2), [#allocation5], 16   ;;  %p871_p9 = pmov %p870_p2 }
  0x61   : > { %s793_s27 = sand.u32 1, %s585_s13   ;;  %p872_p11 = scmp.ne.s32.totalorder %s862_s22, 0 }
  0x62   : > { %566 = vsyncadd (%p871_p9), [#allocation5], 4294967280  ;;  %s376_s17 = sshll.u32 %s793_s27, 3  ;;  %s194_s30 = scalar_lea.sflag [#allocation3], %s793_s27 }
  0x63   : > { %s197_s7 = scalar_lea.vmem [#allocation6], %s376_s17 }
  0x64   : > { %568 = dma.done.wait (%p872_p11), %s194_s30, 128  }
  0x65   : > { %570 = vsyncadd (%p872_p11), %s194_s30, 4294967168  ;;  %s203_s25 = scalar_lea.sflag [#allocation8], %s793_s27  ;;  %s206_s11 = scalar_lea.vmem [#allocation7], %s376_s17 }
  0x66   : > { %572 = dma.done.wait (%p872_p11), %s203_s25, 128  }
  0x67   : > { %574 = vsyncadd (%p872_p11), %s203_s25, 4294967168 }
  0x68   : > { %211 = sfence }
  0x69   : > { %s235_s19 = sld [smem:[#allocation2]]  ;;  %s379_s20 = sld [smem:[#allocation2 + $0x1]]  ;;  %v239_v0 = vld [vmem:[%s197_s7] sm:$0xff]  ;;  %v242_v1 = vld [vmem:[%s206_s11] sm:$0xff] }
  0x6a   : > { %s234_s29 = scalar_lea.vmem [#allocation9], %s376_s17  ;;  %s381_s4 = sshll.u32 %s640_s16, 7 }
  0x6b   : > { %s261_s8 = sshll.u32 %s234_s29, 4  ;;  %s812_s28 = scalar_lea.hbm %s857_s3, %s381_s4  ;;  %s807_s8 = int_to_ptr.vmem [resolvable:$true] %s261_s8 }
  0x6c   : > { %s248_s10 = scalar_lea.sflag [#allocation4], %s793_s27  ;;  %s519_s9 = scalar_lea.vmem %s807_s8, 128 }
  0x6d   : > { %p520_p0 = scmp.ne.s32.totalorder %s807_s8, %s519_s9  ;;  %p873_p8 = scmp.ne.s32.totalorder %s863_s23, 0 }
  0x6e   : > { %s598_s16 = smov [#allocation9]  }
  0x6f   : > { %s236_s5 = smul.f32 %s235_s19, %s235_s19  ;;  %p521_p7 = pnand %p520_p0, %p873_p8 }
  0x70   : > { %s238_s6 = smul.f32 %s379_s20, %s379_s20  ;;  %s523_s17 = sshll.u32 %s598_s16, 4  ;;  %s524_s17 = int_to_ptr.vmem [resolvable:$false] %s523_s17 }
  0x71   : > { %v240_v2 = vstv %s236_s5  ;;  %p522_p3 = pneg %p521_p7  ;;  %s525_s30 = scalar_lea.vmem %s524_s17, 256 }
  0x72   : > { %v241_v3 = vmul.f32 %v240_v2, %v239_v0  ;;  %v243_v4 = vstv %s238_s6  ;;  %p526_p1 = scmp.lt.s32.totalorder %s807_s8, %s524_s17  ;;  %p527_p4 = scmp.lt.s32.totalorder %s525_s30, %s519_s9 }
  0x73   : > { %v244_v5 = vmul.f32 %v243_v4, %v242_v1 }
  0x74   : > { %p528_p5 = por %p527_p4, %p526_p1 }
  0x75   : > { %v245_v6 = vadd.f32 %v244_v5, %v241_v3 }
  0x76   : > { %p529_p6 = pnand %p528_p5, %p522_p3 }
  0x77   : > { %246 = vst [vmem:[%s234_s29] sm:$0xff] %v245_v6 }
  0x78   : > { %532 = shalt.err (!%p529_p6)
}
  0x79   : > { %s533_s27 = scalar_lea.hbm %s812_s28, 128  ;;  %s537_s11 = scalar_lea.hbm %s857_s3, 256 }
  0x7a   : > { %p534_p12 = scmp.ne.s32.totalorder %s812_s28, %s533_s27  ;;  %p538_p2 = scmp.lt.u32.totalorder %s812_s28, %s857_s3 }
  0x7b   : > { %p539_p9 = scmp.lt.u32.totalorder %s537_s11, %s533_s27  ;;  %p541_p0 = scmp.lt.u32.totalorder %s533_s27, %s812_s28 }
  0x7c   : > { %p535_p13 = pnand %p534_p12, %p873_p8 }
  0x7d   : > { %p540_p11 = por %p539_p9, %p538_p2 }
  0x7e   : > { %p536_p10 = pneg %p535_p13 }
  0x7f   : > { %p542_p7 = por %p541_p0, %p540_p11 }
  0x81   : > { %p543_p3 = pnand %p542_p7, %p536_p10 }
  0x83   : > { %546 = shalt.err (!%p543_p3)
}
  0x84   : > { %392 = dma.vmem_to_hbm [thread:$0]  (%p873_p8), %s807_s8, 128, %s812_s28, %s248_s10  }
  0x85 PF: > { %s273_s5 = sand.u32 1, %s581_s12   ;;  %p874_p1 = scmp.ne.s32.totalorder %s864_s24, 0 }
  0x86   : > { %p875_p4 = scmp.ge.s32.totalorder %s593_s15, 2  ;;  %s274_s6 = scalar_lea.sflag [#allocation4], %s273_s5 }
  0x88   : > { %p406_p5 = pnand %p875_p4, %p874_p1 }
  0x8a   : > { %576 = dma.done.wait (!%p406_p5), %s274_s6, 128  }
  0x8b   : > { %578 = vsyncadd (!%p406_p5), %s274_s6, 4294967168  ;;  %p20_p6 = scmp.ge.s32.totalorder %s644_s18, 4   ;;  %s876_s12 = smov %s585_s13 }
  0x8c   : > { %s877_s13 = smov %s589_s14  ;;  %s878_s14 = smov %s656_s21 }
  0x8d   : > { %s879_s15 = smov %s644_s18  ;;  %22 = sbr.rel (!%p20_p6) target bundleno = 8 (0x8), region = 95 }
  0x94   :  { %279 = vsyncpa [#allocation3], 1 }
  0x95   :  { %281 = vsyncpa [#allocation3 + $0x1], 1 }
  0x96   :  { %282 = vsyncpa [#allocation8], 1 }
  0x97   :  { %284 = vsyncpa [#allocation8 + $0x1], 1 }
  0x98   :  { %285 = vsyncpa [#allocation4], 1 }
  0x99   :  { %287 = vsyncpa [#allocation4 + $0x1], 1 }
  0x9a   :  { %288 = vsyncpa [#allocation5], 1 }
  0x9b   :  { %290 = vsyncpa [#allocation5 + $0x1], 1 }

</bundles_post_ra>
